<compile_context>
chip_gen: v7x
topology: tpu7x:2x2x1
jax: 0.10.0
libtpu: 0.0.40
codegen_flags: <defaults>
</compile_context>

<pallas_src>
import jax
import jax.numpy as jnp
from jax.experimental import pallas as pl
from jax.experimental.pallas import tpu as pltpu


def _linear_clamp_kernel(x_ref, slab_ref, o_ref):
    # x_ref:    (Bblk, IN)           input rows
    # slab_ref: (IN+1, OUT)          rows 0..IN-1 = 6*W^T, row IN = 6*b
    # o_ref:    (Bblk, OUT)
    x = x_ref[...].astype(jnp.float32)
    slab = slab_ref[...].astype(jnp.float32)
    b_blk = x.shape[0]
    in_dim = slab.shape[0] - 1
    out_dim = slab.shape[1]

    # Start from the (already *6) bias row, broadcast across the batch.
    acc = jnp.broadcast_to(slab[in_dim:in_dim + 1, :], (b_blk, out_dim))

    # VPU broadcast-FMA contraction over the tiny K dimension (unrolled).
    for k in range(in_dim):
        # (Bblk, 1) * (1, OUT) -> (Bblk, OUT), pure VPU work, no MXU padding.
        acc = acc + x[:, k:k + 1] * slab[k:k + 1, :]

    # Folded epilogue: clip(6*m1, 0, 36) + 18  ==  (clip(m1, 0, 6) + 3) * 6
    out = jnp.clip(acc, 0.0, 36.0) + 18.0
    o_ref[...] = out.astype(o_ref.dtype)


def prepare_params(weight, bias):
    """One-time parameter prep (call once at model-init time, NOT per forward).

    weight: (OUT, IN), bias: (OUT,) in PyTorch Linear convention.
    Returns a single (IN+1, OUT) slab = [6*W^T ; 6*b] so the kernel needs only
    one parameter DMA and no per-call scaling/transpose ops.
    """
    out_dim, _ = weight.shape
    wt6 = (6.0 * weight.astype(jnp.float32)).T               # (IN, OUT)
    b6 = (6.0 * bias.astype(jnp.float32)).reshape(1, out_dim)  # (1, OUT)
    return jnp.concatenate([wt6, b6], axis=0)                 # (IN+1, OUT)


_TB = 1024  # batch tile for the large-B path (multiple of 8 -> (8,128)-legal)


def model_forward(x, param_slab):
    """x: (B, IN); param_slab: (IN+1, OUT) from prepare_params."""
    B, IN = x.shape
    OUT = param_slab.shape[1]

    if B >= 2 * _TB and B % _TB == 0:
        # Large-batch path: tile B, mark it parallel (2x on v7x dual TC),
        # keeps per-step VMEM bounded (v7x has only 64 MiB physical VMEM).
        return pl.pallas_call(
            _linear_clamp_kernel,
            out_shape=jax.ShapeDtypeStruct((B, OUT), x.dtype),
            grid=(B // _TB,),
            in_specs=[
                pl.BlockSpec((_TB, IN), lambda i: (i, 0)),
                pl.BlockSpec((IN + 1, OUT), lambda i: (0, 0)),
            ],
            out_specs=pl.BlockSpec((_TB, OUT), lambda i: (i, 0)),
            compiler_params=pltpu.CompilerParams(
                dimension_semantics=("parallel",)),
        )(x, param_slab)

    # Small-batch path: single-shot, whole-array VMEM residency, no grid
    # bookkeeping, exactly two input DMAs (x, packed params).
    vmem_spec = pl.BlockSpec(memory_space=pltpu.MemorySpace.VMEM)
    return pl.pallas_call(
        _linear_clamp_kernel,
        out_shape=jax.ShapeDtypeStruct((B, OUT), x.dtype),
        in_specs=[vmem_spec, vmem_spec],
        out_specs=vmem_spec,
    )(x, param_slab)


if __name__ == "__main__":
    key = jax.random.PRNGKey(0)
    kx, kw, kb = jax.random.split(key, 3)

    B, IN, OUT = 8, 3, 3

    # Deterministic PyTorch-style init: uniform(-1/sqrt(in), 1/sqrt(in))
    bound = 1.0 / jnp.sqrt(jnp.float32(IN))
    weight = jax.random.uniform(kw, (OUT, IN), jnp.float32, -bound, bound)
    bias = jax.random.uniform(kb, (OUT,), jnp.float32, -bound, bound)

    x1 = jax.random.normal(kx, (B, IN), jnp.float32)

    # Parameter prep happens once, outside the per-call hot path.
    param_slab = jax.block_until_ready(prepare_params(weight, bias))

    fwd = jax.jit(model_forward)
    out = fwd(x1, param_slab)
    jax.block_until_ready(out)

    # Reference check against plain JAX (original op ordering).
    ref = (jnp.clip(x1 @ weight.T + bias, 0.0, 6.0) + 3.0) * 6.0
    assert jnp.allclose(out, ref, atol=1e-5, rtol=1e-5), "mismatch vs reference"

    print("KERNEL_OK")
</pallas_src>

<mosaic_0001>
module attributes {stable_mosaic.version = 11 : i64} {
  func.func @_linear_clamp_kernel(%arg0: memref<8x3xf32, #tpu.memory_space<vmem>>, %arg1: memref<4x3xf32, #tpu.memory_space<vmem>>, %arg2: memref<8x3xf32, #tpu.memory_space<vmem>>) attributes {dimension_semantics = [], scalar_prefetch = 0 : i64, scratch_operands = 0 : i64, tpu.core_type = #tpu.core_type<tc>} {
    %c0 = arith.constant 0 : index
    %c0_0 = arith.constant 0 : index
    %0 = vector.load %arg0[%c0, %c0_0] : memref<8x3xf32, #tpu.memory_space<vmem>>, vector<8x3xf32>
    %c0_1 = arith.constant 0 : index
    %c0_2 = arith.constant 0 : index
    %1 = vector.load %arg1[%c0_1, %c0_2] : memref<4x3xf32, #tpu.memory_space<vmem>>, vector<4x3xf32>
    %2 = vector.extract_strided_slice %1 {offsets = [3, 0], sizes = [1, 3], strides = [1, 1]} : vector<4x3xf32> to vector<1x3xf32>
    %3 = vector.shape_cast %2 : vector<1x3xf32> to vector<1x3xf32>
    %4 = vector.broadcast %3 : vector<1x3xf32> to vector<8x3xf32>
    %5 = vector.extract_strided_slice %0 {offsets = [0, 0], sizes = [8, 1], strides = [1, 1]} : vector<8x3xf32> to vector<8x1xf32>
    %6 = vector.extract_strided_slice %1 {offsets = [0, 0], sizes = [1, 3], strides = [1, 1]} : vector<4x3xf32> to vector<1x3xf32>
    %7 = vector.broadcast %5 : vector<8x1xf32> to vector<8x3xf32>
    %8 = vector.broadcast %6 : vector<1x3xf32> to vector<8x3xf32>
    %9 = arith.mulf %7, %8 : vector<8x3xf32>
    %10 = arith.addf %4, %9 : vector<8x3xf32>
    %11 = vector.extract_strided_slice %0 {offsets = [0, 1], sizes = [8, 1], strides = [1, 1]} : vector<8x3xf32> to vector<8x1xf32>
    %12 = vector.extract_strided_slice %1 {offsets = [1, 0], sizes = [1, 3], strides = [1, 1]} : vector<4x3xf32> to vector<1x3xf32>
    %13 = vector.broadcast %11 : vector<8x1xf32> to vector<8x3xf32>
    %14 = vector.broadcast %12 : vector<1x3xf32> to vector<8x3xf32>
    %15 = arith.mulf %13, %14 : vector<8x3xf32>
    %16 = arith.addf %10, %15 : vector<8x3xf32>
    %17 = vector.extract_strided_slice %0 {offsets = [0, 2], sizes = [8, 1], strides = [1, 1]} : vector<8x3xf32> to vector<8x1xf32>
    %18 = vector.extract_strided_slice %1 {offsets = [2, 0], sizes = [1, 3], strides = [1, 1]} : vector<4x3xf32> to vector<1x3xf32>
    %19 = vector.broadcast %17 : vector<8x1xf32> to vector<8x3xf32>
    %20 = vector.broadcast %18 : vector<1x3xf32> to vector<8x3xf32>
    %21 = arith.mulf %19, %20 : vector<8x3xf32>
    %22 = arith.addf %16, %21 : vector<8x3xf32>
    %cst = arith.constant 0.000000e+00 : f32
    %cst_3 = arith.constant 3.600000e+01 : f32
    %23 = vector.broadcast %cst : f32 to vector<8x3xf32>
    %24 = arith.maximumf %23, %22 : vector<8x3xf32>
    %25 = vector.broadcast %cst_3 : f32 to vector<8x3xf32>
    %26 = arith.minimumf %25, %24 : vector<8x3xf32>
    %cst_4 = arith.constant 1.800000e+01 : f32
    %27 = vector.broadcast %cst_4 : f32 to vector<8x3xf32>
    %28 = arith.addf %26, %27 : vector<8x3xf32>
    %c0_5 = arith.constant 0 : index
    %c0_6 = arith.constant 0 : index
    %29 = vector.load %arg2[%c0_5, %c0_6] : memref<8x3xf32, #tpu.memory_space<vmem>>, vector<8x3xf32>
    tpu.vector_store %arg2[%c0_5, %c0_6], %28 {strides = array<i32>} : memref<8x3xf32, #tpu.memory_space<vmem>>, vector<8x3xf32>,
    return
  }
}

</mosaic_0001>

<bundles_post_ra>
// kernel: model_forward.1
= control target key start
LH: loop header
LB: loop body
LE: loop exit
PB: predicated region body
PF: predicated region fallthrough
CT: control target
= control target key end

     0   :  { %v64_v0 = vmov 0   ;;  %v65_v2 = vmov 2   ;;  %v66_v3 = vmov 1   ;;  %v13_v4 = vlaneseq  ;;  %s91_s0 = inlined_call_operand.vmem [shape: f32[8,3], index: 0, kind: input, shape index: {}]   ;;  %s92_s1 = inlined_call_operand.vmem [shape: f32[4,3], index: 1, kind: input, shape index: {}]   ;;  %s93_s2 = inlined_call_operand.vmem [shape: f32[8,3], index: 2, kind: output, shape index: {}]  }
   0x1   :  { %60 = vset.pattern.permute.xlu0 %v64_v0  ;;  %v11_v1 = vld [vmem:[%s91_s0] sm:$0xff]  ;;  %62 = vset.pattern.permute.xlu1 %v65_v2  ;;  %vm51_vm0 = vcmask 23552  }
   0x2   :  { %19 = vperm.xlu0 %60, %v11_v1   ;;  %39 = vperm.xlu1 %62, %v11_v1   ;;  %v14_v5 = vshrl.u32 %v13_v4, 7  ;;  %v12_v7 = vld [vmem:[%s92_s1] sm:$0xf] }
   0x4   :  { %v24_v6 = vsub.s32 0, %v14_v5  ;;  %v15_v8 = vsub.s32 3, %v14_v5  ;;  %v34_v10 = vsub.s32 1, %v14_v5  ;;  %v44_v11 = vsub.s32 2, %v14_v5 }
   0x6   :  { %61 = vset.pattern.permute.xlu0 %v66_v3  ;;  %v25_v9 = vrot.slane %v12_v7, %v24_v6  ;;  %v16_v13 = vrot.slane %v12_v7, %v15_v8  ;;  %v35_v15 = vrot.slane %v12_v7, %v34_v10  ;;  %v45_v16 = vrot.slane %v12_v7, %v44_v11 }
   0x7   :  { %29 = vperm.xlu0 %61, %v11_v1  }
   0xb   :  { %63 = vset.pattern.permute.xlu0 %v65_v2 }
  0x81   :  { %v20_v12 = vpop.permute.xlu0 %19  ;;  %v40_v17 = vpop.permute.xlu1 %39 }
  0x82   :  { %v26_v14 = vmul.f32 %v25_v9, %v20_v12  ;;  %v46_v21 = vmul.f32 %v45_v16, %v40_v17 }
  0x84   :  { %v27_v19 = vadd.f32 %v26_v14, %v16_v13 }
  0x86   :  { %v30_v18 = vpop.permute.xlu0 %29 }
  0x87   :  { %v36_v20 = vmul.f32 %v35_v15, %v30_v18 }
  0x89   :  { %v37_v22 = vadd.f32 %v36_v20, %v27_v19 }
  0x8b   :  { %v47_v23 = vadd.f32 %v46_v21, %v37_v22 }
  0x8d   :  { %v48_v24 = vmax.f32 %v47_v23, 0.0 }
  0x8f   :  { %v49_v25 = vmin.f32 %v48_v24, 36.0 }
  0x91   :  { %v50_v26 = vadd.f32 18.0, %v49_v25 }
  0x93   :  { %52 = vst.msk [vmem:[%s93_s2] sm:$0xff] %vm51_vm0, %v50_v26 }

</bundles_post_ra>
